<compile_context>
chip_gen: v6e
topology: v6e:2x2x1
jax: 0.10.0
libtpu: 0.0.40
codegen_flags: <defaults>
</compile_context>

<pallas_src>
import functools
import math

import jax
import jax.numpy as jnp
from jax.experimental import pallas as pl
from jax.experimental.pallas import tpu as pltpu

EPS = 1e-5
NEG_SLOPE = 0.2


def _round_up(x, m):
    return (x + m - 1) // m * m


def _leaky_relu(x):
    # For slope in (0,1): max(x, slope*x) == LeakyReLU(slope).  2 VPU ops vs 3 for where().
    return jnp.maximum(x, NEG_SLOPE * x)


def _batchnorm_train(h, gamma, beta, row_mask, inv_n):
    """Training-mode BatchNorm1d over the batch axis (biased variance), fused stats.

    Padded batch rows are excluded via `row_mask`; `inv_n` = 1 / true_batch.
    Applied as a single multiply-add: h * scale + shift.  rsqrt -> EUP (free slot).
    """
    hm = h * row_mask
    s = jnp.sum(hm, axis=0, keepdims=True)
    ss = jnp.sum(hm * hm, axis=0, keepdims=True)
    mean = s * inv_n
    var = jnp.maximum(ss * inv_n - mean * mean, 0.0)
    scale = gamma * jax.lax.rsqrt(var + EPS)
    shift = beta - mean * scale
    return h * scale + shift


def _dense_encoder_kernel(
    x_ref,
    w1_ref, b1_ref, g1_ref, be1_ref,
    w2_ref, b2_ref, g2_ref, be2_ref,
    w3_ref, b3_ref,
    o_ref,
    acc_ref,
    *, true_batch,
):
    j = pl.program_id(0)
    nj = pl.num_programs(0)

    @pl.when(j == 0)
    def _init():
        acc_ref[...] = jnp.zeros_like(acc_ref)

    b_pad = x_ref.shape[0]
    row_ids = jax.lax.broadcasted_iota(jnp.int32, (b_pad, 1), 0)
    row_mask = (row_ids < true_batch).astype(jnp.float32)
    inv_n = jnp.float32(1.0 / true_batch)

    # ---- Layer 1, hidden-feature tile j: Linear -> BN -> LeakyReLU (bf16 MXU, f32 acc) ----
    x = x_ref[...]  # bf16 (B_pad, D_pad)
    h1 = jnp.dot(x, w1_ref[...], preferred_element_type=jnp.float32) + b1_ref[...]
    h1 = _batchnorm_train(h1, g1_ref[...], be1_ref[...], row_mask, inv_n)
    h1 = _leaky_relu(h1)

    # ---- Layer 2 partial product: acc += h1_tile @ w2[tile, :] ----
    acc_ref[...] += jnp.dot(h1.astype(jnp.bfloat16), w2_ref[...],
                            preferred_element_type=jnp.float32)

    # ---- Finalize once all hidden tiles are accumulated: BN -> LeakyReLU -> Linear 3 ----
    @pl.when(j == nj - 1)
    def _finalize():
        h2 = acc_ref[...] + b2_ref[...]
        h2 = _batchnorm_train(h2, g2_ref[...], be2_ref[...], row_mask, inv_n)
        h2 = _leaky_relu(h2)
        out = jnp.dot(h2.astype(jnp.bfloat16), w3_ref[...],
                      preferred_element_type=jnp.float32) + b3_ref[...]
        o_ref[...] = out.astype(o_ref.dtype)


def dense_encoder(x, params, *, hidden_tile=None):
    """x: (B, data_size) f32.  params: f32 master weights, pre-transposed to (in, out);
    biases / BN affine params stored as (1, F) rows."""
    B, D = x.shape
    H = params["w1"].shape[1]
    L = params["w3"].shape[1]

    B_pad = _round_up(max(B, 1), 16)   # sublane multiple (bf16-friendly)
    D_pad = _round_up(D, 128)
    H_pad = _round_up(H, 128)
    L_pad = _round_up(L, 128)

    if hidden_tile is None:
        hidden_tile = 128
        for cand in (512, 256, 128):
            if H_pad % cand == 0:
                hidden_tile = cand
                break
    assert H_pad % hidden_tile == 0
    th = hidden_tile
    nj = H_pad // th

    def pad2(a, r, c, dtype):
        a = jnp.pad(a, ((0, r - a.shape[0]), (0, c - a.shape[1])))
        return a.astype(dtype)

    # Zero-padding is statistics-safe: padded features come out exactly 0 after BN and
    # contribute nothing through zero-padded weight rows; padded batch rows are masked.
    xp  = pad2(x,             B_pad, D_pad, jnp.bfloat16)
    w1  = pad2(params["w1"],  D_pad, H_pad, jnp.bfloat16)
    w2  = pad2(params["w2"],  H_pad, H_pad, jnp.bfloat16)
    w3  = pad2(params["w3"],  H_pad, L_pad, jnp.bfloat16)
    b1  = pad2(params["b1"],  1, H_pad, jnp.float32)
    g1  = pad2(params["g1"],  1, H_pad, jnp.float32)
    be1 = pad2(params["be1"], 1, H_pad, jnp.float32)
    b2  = pad2(params["b2"],  1, H_pad, jnp.float32)
    g2  = pad2(params["g2"],  1, H_pad, jnp.float32)
    be2 = pad2(params["be2"], 1, H_pad, jnp.float32)
    b3  = pad2(params["b3"],  1, L_pad, jnp.float32)

    in_specs = [
        pl.BlockSpec((B_pad, D_pad), lambda j: (0, 0)),   # x: resident across hidden tiles
        pl.BlockSpec((D_pad, th),    lambda j: (0, j)),   # w1 column tile (pipelined)
        pl.BlockSpec((1, th),        lambda j: (0, j)),   # b1 tile
        pl.BlockSpec((1, th),        lambda j: (0, j)),   # gamma1 tile
        pl.BlockSpec((1, th),        lambda j: (0, j)),   # beta1 tile
        pl.BlockSpec((th, H_pad),    lambda j: (j, 0)),   # w2 row tile (pipelined)
        pl.BlockSpec((1, H_pad),     lambda j: (0, 0)),   # b2
        pl.BlockSpec((1, H_pad),     lambda j: (0, 0)),   # gamma2
        pl.BlockSpec((1, H_pad),     lambda j: (0, 0)),   # beta2
        pl.BlockSpec((H_pad, L_pad), lambda j: (0, 0)),   # w3 (resident)
        pl.BlockSpec((1, L_pad),     lambda j: (0, 0)),   # b3
    ]
    out_spec = pl.BlockSpec((B_pad, L_pad), lambda j: (0, 0))   # lane-dense output slab

    # VMEM budget: double-buffered blocks + f32 accumulator + headroom (fits v7x's 64 MiB).
    block_bytes = (
        B_pad * D_pad * 2
        + D_pad * th * 2 + 3 * th * 4
        + th * H_pad * 2 + 3 * H_pad * 4
        + H_pad * L_pad * 2 + L_pad * 4
        + B_pad * L_pad * 4
    )
    acc_bytes = B_pad * H_pad * 4
    vmem_limit = int(min(max(2 * block_bytes + acc_bytes + (4 << 20), 32 << 20), 64 << 20))

    cost = pl.CostEstimate(
        flops=int(2 * B_pad * (D_pad * H_pad + H_pad * H_pad + H_pad * L_pad)),
        transcendentals=int(2 * H_pad),
        bytes_accessed=int(
            xp.size * 2 + w1.size * 2 + w2.size * 2 + w3.size * 2
            + (b1.size + g1.size + be1.size + b2.size + g2.size + be2.size + b3.size) * 4
            + B_pad * L_pad * 4
        ),
    )

    out_padded = pl.pallas_call(
        functools.partial(_dense_encoder_kernel, true_batch=B),
        out_shape=jax.ShapeDtypeStruct((B_pad, L_pad), jnp.float32),
        grid=(nj,),
        in_specs=in_specs,
        out_specs=out_spec,
        scratch_shapes=[pltpu.VMEM((B_pad, H_pad), jnp.float32)],
        compiler_params=pltpu.CompilerParams(
            dimension_semantics=("arbitrary",),   # reduction over hidden tiles into acc
            vmem_limit_bytes=vmem_limit,
        ),
        cost_estimate=cost,
    )(xp, w1, b1, g1, be1, w2, b2, g2, be2, w3, b3)

    return out_padded[:B, :L]


def init_params(key, data_size, hidden_size, latent_size):
    """Deterministic synthetic init (PyTorch-like fan-in scaling). Linear weights stored
    pre-transposed (in, out); biases / BN affine params as (1, F) rows."""
    ks = jax.random.split(key, 6)
    s1 = 1.0 / math.sqrt(data_size)
    s2 = 1.0 / math.sqrt(hidden_size)
    return {
        "w1": jax.random.uniform(ks[0], (data_size, hidden_size), jnp.float32, -s1, s1),
        "b1": jax.random.uniform(ks[1], (1, hidden_size), jnp.float32, -s1, s1),
        "g1": jnp.ones((1, hidden_size), jnp.float32),
        "be1": jnp.zeros((1, hidden_size), jnp.float32),
        "w2": jax.random.uniform(ks[2], (hidden_size, hidden_size), jnp.float32, -s2, s2),
        "b2": jax.random.uniform(ks[3], (1, hidden_size), jnp.float32, -s2, s2),
        "g2": jnp.ones((1, hidden_size), jnp.float32),
        "be2": jnp.zeros((1, hidden_size), jnp.float32),
        "w3": jax.random.uniform(ks[4], (hidden_size, latent_size), jnp.float32, -s2, s2),
        "b3": jax.random.uniform(ks[5], (1, latent_size), jnp.float32, -s2, s2),
    }


def dense_encoder_ref(x, p):
    """Pure-JAX reference with PyTorch training-mode BN semantics, mirroring the kernel's
    bf16 matmul operands (f32 accumulation) so the comparison isolates kernel bugs."""
    def bf(a):
        return a.astype(jnp.bfloat16).astype(jnp.float32)

    def bn(h, g, b):
        m = jnp.mean(h, axis=0, keepdims=True)
        v = jnp.mean((h - m) ** 2, axis=0, keepdims=True)
        return (h - m) / jnp.sqrt(v + EPS) * g + b

    h = bf(x) @ bf(p["w1"]) + p["b1"]
    h = bn(h, p["g1"], p["be1"])
    h = jnp.maximum(h, NEG_SLOPE * h)
    h = bf(h) @ bf(p["w2"]) + p["b2"]
    h = bn(h, p["g2"], p["be2"])
    h = jnp.maximum(h, NEG_SLOPE * h)
    return bf(h) @ bf(p["w3"]) + p["b3"]


if __name__ == "__main__":
    data_size, hidden_size, latent_size = 16, 32, 8
    batch = 8

    key = jax.random.PRNGKey(0)
    kx, kp = jax.random.split(key)
    x = jax.random.normal(kx, (batch, data_size), jnp.float32)
    params = init_params(kp, data_size, hidden_size, latent_size)

    out = dense_encoder(x, params)
    out = jax.block_until_ready(out)

    ref = dense_encoder_ref(x, params)
    assert out.shape == (batch, latent_size)
    assert jnp.allclose(out, ref, atol=3e-2, rtol=3e-2), float(jnp.max(jnp.abs(out - ref)))

    print("KERNEL_OK")
</pallas_src>

<mosaic_0001>
module attributes {stable_mosaic.version = 11 : i64} {
  func.func @_dense_encoder_kernel(%arg0: i32, %arg1: memref<16x128xbf16, #tpu.memory_space<vmem>>, %arg2: memref<128x128xbf16, #tpu.memory_space<vmem>>, %arg3: memref<1x128xf32, #tpu.memory_space<vmem>>, %arg4: memref<1x128xf32, #tpu.memory_space<vmem>>, %arg5: memref<1x128xf32, #tpu.memory_space<vmem>>, %arg6: memref<128x128xbf16, #tpu.memory_space<vmem>>, %arg7: memref<1x128xf32, #tpu.memory_space<vmem>>, %arg8: memref<1x128xf32, #tpu.memory_space<vmem>>, %arg9: memref<1x128xf32, #tpu.memory_space<vmem>>, %arg10: memref<128x128xbf16, #tpu.memory_space<vmem>>, %arg11: memref<1x128xf32, #tpu.memory_space<vmem>>, %arg12: memref<16x128xf32, #tpu.memory_space<vmem>>, %arg13: memref<16x128xf32, #tpu.memory_space<vmem>>) attributes {dimension_semantics = [#tpu.dimension_semantics<arbitrary>], iteration_bounds = array<i64: 1>, scalar_prefetch = 0 : i64, scratch_operands = 1 : i64, tpu.core_type = #tpu.core_type<tc>, window_params = [{pipeline_mode = #tpu.pipeline_mode<synchronous>, transform_indices = @transform_0, window_bounds = array<i64: 16, 128>}, {transform_indices = @transform_1, window_bounds = array<i64: 128, 128>}, {transform_indices = @transform_2, window_bounds = array<i64: 1, 128>}, {transform_indices = @transform_3, window_bounds = array<i64: 1, 128>}, {transform_indices = @transform_4, window_bounds = array<i64: 1, 128>}, {transform_indices = @transform_5, window_bounds = array<i64: 128, 128>}, {pipeline_mode = #tpu.pipeline_mode<synchronous>, transform_indices = @transform_6, window_bounds = array<i64: 1, 128>}, {pipeline_mode = #tpu.pipeline_mode<synchronous>, transform_indices = @transform_7, window_bounds = array<i64: 1, 128>}, {pipeline_mode = #tpu.pipeline_mode<synchronous>, transform_indices = @transform_8, window_bounds = array<i64: 1, 128>}, {pipeline_mode = #tpu.pipeline_mode<synchronous>, transform_indices = @transform_9, window_bounds = array<i64: 128, 128>}, {pipeline_mode = #tpu.pipeline_mode<synchronous>, transform_indices = @transform_10, window_bounds = array<i64: 1, 128>}, {pipeline_mode = #tpu.pipeline_mode<synchronous>, transform_indices = @transform_11, window_bounds = array<i64: 16, 128>}]} {
    %c0_i32 = arith.constant 0 : i32
    %0 = arith.cmpi eq, %arg0, %c0_i32 : i32
    %1 = arith.extui %0 : i1 to i32
    %c0_i32_0 = arith.constant 0 : i32
    %2 = arith.cmpi ne, %1, %c0_i32_0 : i32
    scf.if %2 {
      %cst_27 = arith.constant 0.000000e+00 : f32
      %53 = vector.broadcast %cst_27 : f32 to vector<16x128xf32>
      %c0_28 = arith.constant 0 : index
      %c0_29 = arith.constant 0 : index
      %54 = vector.load %arg13[%c0_28, %c0_29] : memref<16x128xf32, #tpu.memory_space<vmem>>, vector<16x128xf32>
      tpu.vector_store %arg13[%c0_28, %c0_29], %53 {strides = array<i32>} : memref<16x128xf32, #tpu.memory_space<vmem>>, vector<16x128xf32>,
    } else {
    }
    %3 = tpu.iota {dimensions = array<i32: 0>} : vector<16x1xi32>
    %c8_i32 = arith.constant 8 : i32
    %4 = vector.broadcast %c8_i32 : i32 to vector<16x1xi32>
    %5 = arith.cmpi slt, %3, %4 : vector<16x1xi32>
    %6 = arith.extui %5 : vector<16x1xi1> to vector<16x1xi32>
    %7 = arith.sitofp %6 : vector<16x1xi32> to vector<16x1xf32>
    %c0 = arith.constant 0 : index
    %c0_1 = arith.constant 0 : index
    %8 = vector.load %arg1[%c0, %c0_1] : memref<16x128xbf16, #tpu.memory_space<vmem>>, vector<16x128xbf16>
    %c0_2 = arith.constant 0 : index
    %c0_3 = arith.constant 0 : index
    %9 = vector.load %arg2[%c0_2, %c0_3] : memref<128x128xbf16, #tpu.memory_space<vmem>>, vector<128x128xbf16>
    %cst = arith.constant dense<0.000000e+00> : vector<16x128xf32>
    %10 = tpu.matmul %8, %9, %cst {dimension_numbers = #tpu.dot_dimension_numbers<[1], [0], [0], [1], [0, 0, 1, 1], [], []>} : vector<16x128xbf16>, vector<128x128xbf16>, vector<16x128xf32> -> vector<16x128xf32>
    %c0_4 = arith.constant 0 : index
    %c0_5 = arith.constant 0 : index
    %11 = vector.load %arg3[%c0_4, %c0_5] : memref<1x128xf32, #tpu.memory_space<vmem>>, vector<1x128xf32>
    %12 = vector.broadcast %11 : vector<1x128xf32> to vector<16x128xf32>
    %13 = arith.addf %10, %12 : vector<16x128xf32>
    %c0_6 = arith.constant 0 : index
    %c0_7 = arith.constant 0 : index
    %14 = vector.load %arg4[%c0_6, %c0_7] : memref<1x128xf32, #tpu.memory_space<vmem>>, vector<1x128xf32>
    %c0_8 = arith.constant 0 : index
    %c0_9 = arith.constant 0 : index
    %15 = vector.load %arg5[%c0_8, %c0_9] : memref<1x128xf32, #tpu.memory_space<vmem>>, vector<1x128xf32>
    %16 = vector.broadcast %7 : vector<16x1xf32> to vector<16x128xf32>
    %17 = arith.mulf %13, %16 : vector<16x128xf32>
    %cst_10 = arith.constant dense<0.000000e+00> : vector<128xf32>
    %18 = vector.multi_reduction <add>, %17, %cst_10 [0] : vector<16x128xf32> to vector<128xf32>
    %19 = vector.shape_cast %18 : vector<128xf32> to vector<1x128xf32>
    %20 = arith.mulf %17, %17 : vector<16x128xf32>
    %cst_11 = arith.constant dense<0.000000e+00> : vector<128xf32>
    %21 = vector.multi_reduction <add>, %20, %cst_11 [0] : vector<16x128xf32> to vector<128xf32>
    %22 = vector.shape_cast %21 : vector<128xf32> to vector<1x128xf32>
    %cst_12 = arith.constant 1.250000e-01 : f32
    %23 = vector.broadcast %cst_12 : f32 to vector<1x128xf32>
    %24 = arith.mulf %19, %23 : vector<1x128xf32>
    %cst_13 = arith.constant 1.250000e-01 : f32
    %25 = vector.broadcast %cst_13 : f32 to vector<1x128xf32>
    %26 = arith.mulf %22, %25 : vector<1x128xf32>
    %27 = arith.mulf %24, %24 : vector<1x128xf32>
    %28 = arith.subf %26, %27 : vector<1x128xf32>
    %cst_14 = arith.constant 0.000000e+00 : f32
    %29 = vector.broadcast %cst_14 : f32 to vector<1x128xf32>
    %30 = arith.maximumf %28, %29 : vector<1x128xf32>
    %cst_15 = arith.constant 9.99999974E-6 : f32
    %31 = vector.broadcast %cst_15 : f32 to vector<1x128xf32>
    %32 = arith.addf %30, %31 : vector<1x128xf32>
    %33 = math.rsqrt %32 : vector<1x128xf32>
    %34 = arith.mulf %14, %33 : vector<1x128xf32>
    %35 = arith.mulf %24, %34 : vector<1x128xf32>
    %36 = arith.subf %15, %35 : vector<1x128xf32>
    %37 = vector.broadcast %34 : vector<1x128xf32> to vector<16x128xf32>
    %38 = arith.mulf %13, %37 : vector<16x128xf32>
    %39 = vector.broadcast %36 : vector<1x128xf32> to vector<16x128xf32>
    %40 = arith.addf %38, %39 : vector<16x128xf32>
    %cst_16 = arith.constant 2.000000e-01 : f32
    %41 = vector.broadcast %cst_16 : f32 to vector<16x128xf32>
    %42 = arith.mulf %41, %40 : vector<16x128xf32>
    %43 = arith.maximumf %40, %42 : vector<16x128xf32>
    %c0_17 = arith.constant 0 : index
    %c0_18 = arith.constant 0 : index
    %44 = vector.load %arg13[%c0_17, %c0_18] : memref<16x128xf32, #tpu.memory_space<vmem>>, vector<16x128xf32>
    %45 = arith.truncf %43 : vector<16x128xf32> to vector<16x128xbf16>
    %c0_19 = arith.constant 0 : index
    %c0_20 = arith.constant 0 : index
    %46 = vector.load %arg6[%c0_19, %c0_20] : memref<128x128xbf16, #tpu.memory_space<vmem>>, vector<128x128xbf16>
    %cst_21 = arith.constant dense<0.000000e+00> : vector<16x128xf32>
    %47 = tpu.matmul %45, %46, %cst_21 {dimension_numbers = #tpu.dot_dimension_numbers<[1], [0], [0], [1], [0, 0, 1, 1], [], []>} : vector<16x128xbf16>, vector<128x128xbf16>, vector<16x128xf32> -> vector<16x128xf32>
    %48 = arith.addf %44, %47 : vector<16x128xf32>
    %c0_22 = arith.constant 0 : index
    %c0_23 = arith.constant 0 : index
    %49 = vector.load %arg13[%c0_22, %c0_23] : memref<16x128xf32, #tpu.memory_space<vmem>>, vector<16x128xf32>
    tpu.vector_store %arg13[%c0_22, %c0_23], %48 {strides = array<i32>} : memref<16x128xf32, #tpu.memory_space<vmem>>, vector<16x128xf32>,
    %c0_i32_24 = arith.constant 0 : i32
    %50 = arith.cmpi eq, %arg0, %c0_i32_24 : i32
    %51 = arith.extui %50 : i1 to i32
    %cst_25 = arith.constant 1.250000e-01 : f32
    %c0_i32_26 = arith.constant 0 : i32
    %52 = arith.cmpi ne, %51, %c0_i32_26 : i32
    scf.if %52 {
      %c0_27 = arith.constant 0 : index
      %c0_28 = arith.constant 0 : index
      %53 = vector.load %arg13[%c0_27, %c0_28] : memref<16x128xf32, #tpu.memory_space<vmem>>, vector<16x128xf32>
      %c0_29 = arith.constant 0 : index
      %c0_30 = arith.constant 0 : index
      %54 = vector.load %arg7[%c0_29, %c0_30] : memref<1x128xf32, #tpu.memory_space<vmem>>, vector<1x128xf32>
      %55 = vector.broadcast %54 : vector<1x128xf32> to vector<16x128xf32>
      %56 = arith.addf %53, %55 : vector<16x128xf32>
      %c0_31 = arith.constant 0 : index
      %c0_32 = arith.constant 0 : index
      %57 = vector.load %arg8[%c0_31, %c0_32] : memref<1x128xf32, #tpu.memory_space<vmem>>, vector<1x128xf32>
      %c0_33 = arith.constant 0 : index
      %c0_34 = arith.constant 0 : index
      %58 = vector.load %arg9[%c0_33, %c0_34] : memref<1x128xf32, #tpu.memory_space<vmem>>, vector<1x128xf32>
      %59 = vector.broadcast %7 : vector<16x1xf32> to vector<16x128xf32>
      %60 = arith.mulf %56, %59 : vector<16x128xf32>
      %cst_35 = arith.constant dense<0.000000e+00> : vector<128xf32>
      %61 = vector.multi_reduction <add>, %60, %cst_35 [0] : vector<16x128xf32> to vector<128xf32>
      %62 = vector.shape_cast %61 : vector<128xf32> to vector<1x128xf32>
      %63 = arith.mulf %60, %60 : vector<16x128xf32>
      %cst_36 = arith.constant dense<0.000000e+00> : vector<128xf32>
      %64 = vector.multi_reduction <add>, %63, %cst_36 [0] : vector<16x128xf32> to vector<128xf32>
      %65 = vector.shape_cast %64 : vector<128xf32> to vector<1x128xf32>
      %66 = vector.broadcast %cst_25 : f32 to vector<1x128xf32>
      %67 = arith.mulf %62, %66 : vector<1x128xf32>
      %68 = vector.broadcast %cst_25 : f32 to vector<1x128xf32>
      %69 = arith.mulf %65, %68 : vector<1x128xf32>
      %70 = arith.mulf %67, %67 : vector<1x128xf32>
      %71 = arith.subf %69, %70 : vector<1x128xf32>
      %cst_37 = arith.constant 0.000000e+00 : f32
      %72 = vector.broadcast %cst_37 : f32 to vector<1x128xf32>
      %73 = arith.maximumf %71, %72 : vector<1x128xf32>
      %cst_38 = arith.constant 9.99999974E-6 : f32
      %74 = vector.broadcast %cst_38 : f32 to vector<1x128xf32>
      %75 = arith.addf %73, %74 : vector<1x128xf32>
      %76 = math.rsqrt %75 : vector<1x128xf32>
      %77 = arith.mulf %57, %76 : vector<1x128xf32>
      %78 = arith.mulf %67, %77 : vector<1x128xf32>
      %79 = arith.subf %58, %78 : vector<1x128xf32>
      %80 = vector.broadcast %77 : vector<1x128xf32> to vector<16x128xf32>
      %81 = arith.mulf %56, %80 : vector<16x128xf32>
      %82 = vector.broadcast %79 : vector<1x128xf32> to vector<16x128xf32>
      %83 = arith.addf %81, %82 : vector<16x128xf32>
      %cst_39 = arith.constant 2.000000e-01 : f32
      %84 = vector.broadcast %cst_39 : f32 to vector<16x128xf32>
      %85 = arith.mulf %84, %83 : vector<16x128xf32>
      %86 = arith.maximumf %83, %85 : vector<16x128xf32>
      %87 = arith.truncf %86 : vector<16x128xf32> to vector<16x128xbf16>
      %c0_40 = arith.constant 0 : index
      %c0_41 = arith.constant 0 : index
      %88 = vector.load %arg10[%c0_40, %c0_41] : memref<128x128xbf16, #tpu.memory_space<vmem>>, vector<128x128xbf16>
      %cst_42 = arith.constant dense<0.000000e+00> : vector<16x128xf32>
      %89 = tpu.matmul %87, %88, %cst_42 {dimension_numbers = #tpu.dot_dimension_numbers<[1], [0], [0], [1], [0, 0, 1, 1], [], []>} : vector<16x128xbf16>, vector<128x128xbf16>, vector<16x128xf32> -> vector<16x128xf32>
      %c0_43 = arith.constant 0 : index
      %c0_44 = arith.constant 0 : index
      %90 = vector.load %arg11[%c0_43, %c0_44] : memref<1x128xf32, #tpu.memory_space<vmem>>, vector<1x128xf32>
      %91 = vector.broadcast %90 : vector<1x128xf32> to vector<16x128xf32>
      %92 = arith.addf %89, %91 : vector<16x128xf32>
      %c0_45 = arith.constant 0 : index
      %c0_46 = arith.constant 0 : index
      %93 = vector.load %arg12[%c0_45, %c0_46] : memref<16x128xf32, #tpu.memory_space<vmem>>, vector<16x128xf32>
      tpu.vector_store %arg12[%c0_45, %c0_46], %92 {strides = array<i32>} : memref<16x128xf32, #tpu.memory_space<vmem>>, vector<16x128xf32>,
    } else {
    }
    return
  }
  func.func @transform_0(%arg0: i32) -> (i32, i32) {
    %c0_i32 = arith.constant 0 : i32
    %c0_i32_0 = arith.constant 0 : i32
    %c0_i32_1 = arith.constant 0 : i32
    return %c0_i32, %c0_i32_0 : i32, i32
  }
  func.func @transform_1(%arg0: i32) -> (i32, i32) {
    %c0_i32 = arith.constant 0 : i32
    %c0_i32_0 = arith.constant 0 : i32
    return %c0_i32, %arg0 : i32, i32
  }
  func.func @transform_2(%arg0: i32) -> (i32, i32) {
    %c0_i32 = arith.constant 0 : i32
    %c0_i32_0 = arith.constant 0 : i32
    return %c0_i32, %arg0 : i32, i32
  }
  func.func @transform_3(%arg0: i32) -> (i32, i32) {
    %c0_i32 = arith.constant 0 : i32
    %c0_i32_0 = arith.constant 0 : i32
    return %c0_i32, %arg0 : i32, i32
  }
  func.func @transform_4(%arg0: i32) -> (i32, i32) {
    %c0_i32 = arith.constant 0 : i32
    %c0_i32_0 = arith.constant 0 : i32
    return %c0_i32, %arg0 : i32, i32
  }
  func.func @transform_5(%arg0: i32) -> (i32, i32) {
    %c0_i32 = arith.constant 0 : i32
    %c0_i32_0 = arith.constant 0 : i32
    return %arg0, %c0_i32 : i32, i32
  }
  func.func @transform_6(%arg0: i32) -> (i32, i32) {
    %c0_i32 = arith.constant 0 : i32
    %c0_i32_0 = arith.constant 0 : i32
    %c0_i32_1 = arith.constant 0 : i32
    return %c0_i32, %c0_i32_0 : i32, i32
  }
  func.func @transform_7(%arg0: i32) -> (i32, i32) {
    %c0_i32 = arith.constant 0 : i32
    %c0_i32_0 = arith.constant 0 : i32
    %c0_i32_1 = arith.constant 0 : i32
    return %c0_i32, %c0_i32_0 : i32, i32
  }
  func.func @transform_8(%arg0: i32) -> (i32, i32) {
    %c0_i32 = arith.constant 0 : i32
    %c0_i32_0 = arith.constant 0 : i32
    %c0_i32_1 = arith.constant 0 : i32
    return %c0_i32, %c0_i32_0 : i32, i32
  }
  func.func @transform_9(%arg0: i32) -> (i32, i32) {
    %c0_i32 = arith.constant 0 : i32
    %c0_i32_0 = arith.constant 0 : i32
    %c0_i32_1 = arith.constant 0 : i32
    return %c0_i32, %c0_i32_0 : i32, i32
  }
  func.func @transform_10(%arg0: i32) -> (i32, i32) {
    %c0_i32 = arith.constant 0 : i32
    %c0_i32_0 = arith.constant 0 : i32
    %c0_i32_1 = arith.constant 0 : i32
    return %c0_i32, %c0_i32_0 : i32, i32
  }
  func.func @transform_11(%arg0: i32) -> (i32, i32) {
    %c0_i32 = arith.constant 0 : i32
    %c0_i32_0 = arith.constant 0 : i32
    %c0_i32_1 = arith.constant 0 : i32
    return %c0_i32, %c0_i32_0 : i32, i32
  }
}

</mosaic_0001>

<bundles_post_ra>
// kernel: tpu_custom_call.1
= control target key start
LH: loop header
LB: loop body
LE: loop exit
PB: predicated region body
PF: predicated region fallthrough
CT: control target
= control target key end

     0   :  { %16 = vsyncpa [#allocation4], 0  ;;  %s1008_s0 = inlined_call_operand.hbm [shape: bf16[16,128], index: 0, kind: input, shape index: {}]   ;;  %s1009_s1 = inlined_call_operand.hbm [shape: bf16[128,128], index: 1, kind: input, shape index: {}]   ;;  %s1010_s2 = inlined_call_operand.vmem [shape: f32[1,128], index: 2, kind: input, shape index: {}]   ;;  %s1011_s3 = inlined_call_operand.vmem [shape: f32[1,128], index: 3, kind: input, shape index: {}]   ;;  %s1012_s4 = inlined_call_operand.vmem [shape: f32[1,128], index: 4, kind: input, shape index: {}]   ;;  %s1013_s5 = inlined_call_operand.hbm [shape: bf16[128,128], index: 5, kind: input, shape index: {}]   ;;  %s1014_s6 = inlined_call_operand.vmem [shape: f32[1,128], index: 6, kind: input, shape index: {}]   ;;  %s1015_s7 = inlined_call_operand.vmem [shape: f32[1,128], index: 7, kind: input, shape index: {}]   ;;  %s1016_s8 = inlined_call_operand.vmem [shape: f32[1,128], index: 8, kind: input, shape index: {}]   ;;  %s1017_s9 = inlined_call_operand.hbm [shape: bf16[128,128], index: 9, kind: input, shape index: {}]   ;;  %s1018_s10 = inlined_call_operand.vmem [shape: f32[1,128], index: 10, kind: input, shape index: {}]   ;;  %s1019_s11 = inlined_call_operand.hbm [shape: f32[16,128], index: 11, kind: output, shape index: {}]  }
   0x1   :  { %17 = vsyncpa [#allocation7], 0 }
   0x2   :  { %18 = vsyncpa [#allocation10], 0 }
   0x3   :  { %19 = vsyncpa [#allocation5], 0  ;;  %s853_s17 = smov [#allocation6]   ;;  %s854_s19 = smov [#allocation3]  }
   0x4   :  { %s37_s18 = sshll.u32 %s853_s17, 4  ;;  %s25_s20 = sshll.u32 %s854_s19, 4  ;;  %s38_s18 = int_to_ptr.vmem [resolvable:$true] %s37_s18  ;;  %s26_s20 = int_to_ptr.vmem [resolvable:$true] %s25_s20 }
   0x5   :  { %s753_s21 = scalar_lea.vmem %s38_s18, 1024  ;;  %p758_p1 = scmp.lt.s32.totalorder %s38_s18, %s38_s18 }
   0x6   :  { %p754_p0 = scmp.ne.s32.totalorder %s38_s18, %s753_s21  ;;  %p759_p2 = scmp.lt.s32.totalorder %s753_s21, %s753_s21 }
   0x8   :  { %p760_p3 = por %p759_p2, %p758_p1 }
   0xa   :  { %p761_p4 = pnand %p760_p3, %p754_p0 }
   0xc   :  { %764 = shalt.err (!%p761_p4)
}
   0xd   :  { %s855_s22 = smov 64   ;;  %s856_s23 = smov 4  }
   0xe   :  { %43 = dma.hbm_to_vmem [thread:$0]  %s1009_s1, 1024, %s38_s18, [#allocation7], %s855_s22, %s855_s22, %s856_s23  }
   0xf   :  { %s773_s26 = scalar_lea.vmem %s26_s20, 128  ;;  %p778_p6 = scmp.lt.s32.totalorder %s26_s20, %s26_s20 }
  0x10   :  { %p774_p5 = scmp.ne.s32.totalorder %s26_s20, %s773_s26  ;;  %p779_p7 = scmp.lt.s32.totalorder %s773_s26, %s773_s26 }
  0x12   :  { %p780_p8 = por %p779_p7, %p778_p6 }
  0x14   :  { %p781_p9 = pnand %p780_p8, %p774_p5 }
  0x16   :  { %784 = shalt.err (!%p781_p9)
}
  0x17   :  { %31 = dma.hbm_to_vmem [thread:$0]  %s1008_s0, 128, %s26_s20, [#allocation4], %s855_s22, %s855_s22, %s856_s23  }
  0x18   :  { %s857_s29 = smov [#allocation8]   ;;  %s858_s12 = smov [#allocation9]  }
  0x19   :  { %s55_s30 = sshll.u32 %s857_s29, 4  ;;  %s73_s13 = sshll.u32 %s858_s12, 4  ;;  %s56_s30 = int_to_ptr.vmem [resolvable:$true] %s55_s30  ;;  %s74_s13 = int_to_ptr.vmem [resolvable:$true] %s73_s13 }
  0x1a   :  { %s793_s1 = scalar_lea.vmem %s56_s30, 1024  ;;  %p798_p11 = scmp.lt.s32.totalorder %s56_s30, %s56_s30 }
  0x1b   :  { %p794_p10 = scmp.ne.s32.totalorder %s56_s30, %s793_s1  ;;  %p799_p12 = scmp.lt.s32.totalorder %s793_s1, %s793_s1 }
  0x1d   :  { %p800_p13 = por %p799_p12, %p798_p11 }
  0x1f   :  { %p801_p0 = pnand %p800_p13, %p794_p10 }
  0x21   :  { %804 = shalt.err (!%p801_p0)
}
  0x22   :  { %61 = dma.hbm_to_vmem [thread:$0]  %s1013_s5, 1024, %s56_s30, [#allocation7], %s855_s22, %s855_s22, %s856_s23  }
  0x23   :  { %s813_s0 = scalar_lea.vmem %s74_s13, 1024  ;;  %p818_p2 = scmp.lt.s32.totalorder %s74_s13, %s74_s13 }
  0x24   :  { %p814_p1 = scmp.ne.s32.totalorder %s74_s13, %s813_s0  ;;  %p819_p3 = scmp.lt.s32.totalorder %s813_s0, %s813_s0 }
  0x26   :  { %p820_p4 = por %p819_p3, %p818_p2 }
  0x28   :  { %p821_p5 = pnand %p820_p4, %p814_p1 }
  0x2a   :  { %824 = shalt.err (!%p821_p5)
}
  0x2b   :  { %79 = dma.hbm_to_vmem [thread:$0]  %s1017_s9, 1024, %s74_s13, [#allocation10], %s855_s22, %s855_s22, %s856_s23  }
  0x2c   :  { %845 = dma.done.wait [#allocation4], 128  }
  0x2d   :  { %846 = vsyncadd [#allocation4], 4294967168 }
  0x2e   :  { %847 = dma.done.wait [#allocation7], 2048  }
  0x2f   :  { %848 = vsyncadd [#allocation7], 4294965248 }
  0x30   :  { %849 = dma.done.wait [#allocation10], 1024  }
  0x31   :  { %850 = vsyncadd [#allocation10], 4294966272  ;;  %v859_v0 = vmov 0.0   ;;  %vm860_vm0 = vmmov 0   ;;  %v716_v1 = vld [vmem:[#allocation6 + $0x38] sm:$0xff]   ;;  %v717_v2 = vld [vmem:[#allocation6 + $0x30] sm:$0xff]   ;;  %v261_v48 = vlaneseq }
  0x32   :  { %645 = vmatprep.subr.bf16.mxu0 %v859_v0  ;;  %661 = vmatprep.mubr.msk.bf16.mxu0 %vm860_vm0, %v859_v0  ;;  %v718_v3 = vld [vmem:[#allocation6 + $0x28] sm:$0xff]   ;;  %v719_v4 = vld [vmem:[#allocation6 + $0x20] sm:$0xff]   ;;  %v720_v5 = vld [vmem:[#allocation6 + $0x18] sm:$0xff]  }
  0x33   :  { %665 = vmatprep.subr.bf16.mxu1 %v859_v0  ;;  %681 = vmatprep.mubr.msk.bf16.mxu1 %vm860_vm0, %v859_v0  ;;  %v721_v6 = vld [vmem:[#allocation6 + $0x10] sm:$0xff]   ;;  %v722_v7 = vld [vmem:[#allocation6 + $0x8] sm:$0xff]   ;;  %v723_v8 = vld [vmem:[#allocation6] sm:$0xff]   ;;  %v262_v49 = vshrl.u32 %v261_v48, 7 }
  0x34   :  { %646 = vmatpush3.bf16.msra.mxu0 %v716_v1  ;;  %v724_v9 = vld [vmem:[#allocation3] sm:$0xff]   ;;  %v726_v11 = vld [vmem:[#allocation8 + $0x30] sm:$0xff]   ;;  %v727_v12 = vld [vmem:[#allocation8 + $0x28] sm:$0xff]  }
  0x35   :  { %647 = vmatprep.subr.bf16.mxu0 %v859_v0  ;;  %v725_v10 = vld [vmem:[#allocation8 + $0x38] sm:$0xff]   ;;  %v728_v13 = vld [vmem:[#allocation8 + $0x20] sm:$0xff]   ;;  %v730_v15 = vld [vmem:[#allocation8 + $0x10] sm:$0xff]   ;;  %v977_v51 = vsub.s32 0, %v262_v49 }
  0x36   :  { %666 = vmatpush3.bf16.msra.mxu1 %v725_v10  ;;  %v729_v14 = vld [vmem:[#allocation8 + $0x18] sm:$0xff]   ;;  %v731_v16 = vld [vmem:[#allocation8 + $0x8] sm:$0xff]   ;;  %v732_v17 = vld [vmem:[#allocation8] sm:$0xff]  }
  0x37   :  { %667 = vmatprep.subr.bf16.mxu1 %v859_v0  ;;  %v590_v19 = vld [vmem:[%s1010_s2] ss:$0 sm:$0xff]  ;;  %v738_v10 = vld [vmem:[#allocation9 + $0x10] sm:$0xff]  }
  0x38   :  { %648 = vmatpush3.bf16.msra.mxu0 %v717_v2  ;;  %v230_v50 = vld [vmem:[%s1011_s3] sm:$0x1] }
  0x39   :  { %649 = vmatprep.subr.bf16.mxu0 %v859_v0  ;;  %v231_v54 = vld [vmem:[%s1012_s4] sm:$0x1] }
  0x3a   :  { %668 = vmatpush3.bf16.msra.mxu1 %v726_v11  ;;  %v739_v11 = vld [vmem:[#allocation9 + $0x8] sm:$0xff]  }
  0x3b   :  { %669 = vmatprep.subr.bf16.mxu1 %v859_v0 }
  0x3c   :  { %650 = vmatpush3.bf16.msra.mxu0 %v718_v3 }
  0x3d   :  { %651 = vmatprep.subr.bf16.mxu0 %v859_v0 }
  0x3e   :  { %670 = vmatpush3.bf16.msra.mxu1 %v727_v12  ;;  %v740_v12 = vld [vmem:[#allocation9] sm:$0xff]  }
  0x3f   :  { %671 = vmatprep.subr.bf16.mxu1 %v859_v0 }
  0x40   :  { %652 = vmatpush3.bf16.msra.mxu0 %v719_v4 }
  0x41   :  { %653 = vmatprep.subr.bf16.mxu0 %v859_v0 }
  0x42   :  { %672 = vmatpush3.bf16.msra.mxu1 %v728_v13 }
  0x43   :  { %673 = vmatprep.subr.bf16.mxu1 %v859_v0 }
  0x44   :  { %654 = vmatpush3.bf16.msra.mxu0 %v720_v5  ;;  %v733_v5 = vld [vmem:[#allocation9 + $0x38] sm:$0xff]  }
  0x45   :  { %655 = vmatprep.subr.bf16.mxu0 %v859_v0 }
  0x46   :  { %674 = vmatpush3.bf16.msra.mxu1 %v729_v14  ;;  %v608_v14 = vld [vmem:[%s1014_s6] ss:$0 sm:$0xff] }
  0x47   :  { %675 = vmatprep.subr.bf16.mxu1 %v859_v0 }
  0x48   :  { %656 = vmatpush3.bf16.msra.mxu0 %v721_v6  ;;  %v734_v6 = vld [vmem:[#allocation9 + $0x30] sm:$0xff]  }
  0x49   :  { %657 = vmatprep.subr.bf16.mxu0 %v859_v0 }
  0x4a   :  { %676 = vmatpush3.bf16.msra.mxu1 %v730_v15 }
  0x4b   :  { %677 = vmatprep.subr.bf16.mxu1 %v859_v0 }
  0x4c   :  { %658 = vmatpush3.bf16.msra.mxu0 %v722_v7  ;;  %v735_v7 = vld [vmem:[#allocation9 + $0x28] sm:$0xff]  }
  0x4d   :  { %659 = vmatprep.subr.bf16.mxu0 %v859_v0 }
  0x4e   :  { %678 = vmatpush3.bf16.msra.mxu1 %v731_v16 }
  0x4f   :  { %679 = vmatprep.subr.bf16.mxu1 %v859_v0 }
  0x50   :  { %660 = vmatpush3.bf16.msra.mxu0 %v723_v8  ;;  %v736_v8 = vld [vmem:[#allocation9 + $0x20] sm:$0xff]  }
  0x51   :  { %685 = vmatprep.subr.bf16.mxu0 %v859_v0 }
  0x52   :  { %680 = vmatpush3.bf16.msra.mxu1 %v732_v17 }
  0x53   :  { %662 = vmatmul.mubr.bf16.vlgmr.msra.gmra.mxu0 %v724_v9  ;;  %v737_v9 = vld [vmem:[#allocation9 + $0x18] sm:$0xff]  }
  0x54   :  { %701 = vmatprep.mubr.msk.bf16.mxu0 %vm860_vm0, %v859_v0  ;;  %686 = vmatpush3.bf16.msra.mxu0 %v733_v5 }
  0x55   :  { %687 = vmatprep.subr.bf16.mxu0 %v859_v0 }
  0x58   :  { %688 = vmatpush3.bf16.msra.mxu0 %v734_v6 }
  0x59   :  { %689 = vmatprep.subr.bf16.mxu0 %v859_v0 }
  0x5c   :  { %690 = vmatpush3.bf16.msra.mxu0 %v735_v7 }
  0x5d   :  { %691 = vmatprep.subr.bf16.mxu0 %v859_v0 }
  0x60   :  { %692 = vmatpush3.bf16.msra.mxu0 %v736_v8 }
  0x61   :  { %693 = vmatprep.subr.bf16.mxu0 %v859_v0 }
  0x64   :  { %694 = vmatpush3.bf16.msra.mxu0 %v737_v9 }
  0x65   :  { %695 = vmatprep.subr.bf16.mxu0 %v859_v0 }
  0x68   :  { %696 = vmatpush3.bf16.msra.mxu0 %v738_v10 }
  0x69   :  { %697 = vmatprep.subr.bf16.mxu0 %v859_v0 }
  0x6c   :  { %698 = vmatpush3.bf16.msra.mxu0 %v739_v11 }
  0x6d   :  { %699 = vmatprep.subr.bf16.mxu0 %v859_v0 }
  0x70   :  { %700 = vmatpush3.bf16.msra.mxu0 %v740_v12 }
 0x113   :  { %v223_v18 = vpop.f32.mrf.mxu0 }
 0x114   :  { %v224_v22 = vadd.f32 %v590_v19, %v223_v18 }
 0x115   :  { %v663_v20 = vpop.f32.mrf.mxu0 }
 0x116   :  { %v241_v26 = vmul.f32 %v224_v22, %v224_v22 }
 0x117   :  { %v226_v21 = vpop.f32.mrf.mxu0 }
 0x118   :  { %v227_v23 = vadd.f32 %v590_v19, %v226_v21 }
 0x119   :  { %v664_v24 = vpop.f32.mrf.mxu0 }
 0x11a   :  { %v233_v25 = vmul.f32 0.0, %v227_v23 }
 0x11c   :  { %v234_v27 = vadd.f32 %v233_v25, %v224_v22  ;;  %v242_v28 = vmul.f32 %v233_v25, %v233_v25 }
 0x11e   :  { %v235_v29 = vrot.slane %v234_v27, 4  ;;  %v243_v30 = vadd.f32 %v242_v28, %v241_v26 }
 0x120   :  { %v236_v31 = vadd.f32 %v235_v29, %v234_v27  ;;  %v244_v32 = vrot.slane %v243_v30, 4 }
 0x122   :  { %v237_v33 = vrot.slane %v236_v31, 2  ;;  %v245_v34 = vadd.f32 %v244_v32, %v243_v30 }
 0x124   :  { %v238_v35 = vadd.f32 %v237_v33, %v236_v31  ;;  %v246_v36 = vrot.slane %v245_v34, 2 }
 0x126   :  { %v239_v37 = vrot.slane %v238_v35, 1  ;;  %v247_v38 = vadd.f32 %v246_v36, %v245_v34 }
 0x128   :  { %v240_v39 = vadd.f32 %v239_v37, %v238_v35  ;;  %v248_v40 = vrot.slane %v247_v38, 1 }
 0x12a   :  { %v249_v41 = vadd.f32 %v248_v40, %v247_v38  ;;  %v250_v42 = vmul.f32 0.125, %v240_v39 }
 0x12c   :  { %v251_v43 = vmul.f32 0.125, %v249_v41  ;;  %v252_v44 = vmul.f32 %v250_v42, %v250_v42 }
 0x12e   :  { %v253_v45 = vsub.f32 %v251_v43, %v252_v44 }
 0x130   :  { %v254_v46 = vmax.f32 %v253_v45, 0.0  ;;  %v407_v45 = vld [vmem:[%s1016_s8] sm:$0x1]  ;;  %s861_s8 = smov [#allocation11]  }
 0x131   :  { %s576_s25 = sshll.u32 %s861_s8, 4  ;;  %s577_s25 = int_to_ptr.vmem [resolvable:$true] %s576_s25 }
 0x132   :  { %v255_v47 = vadd.f32 1e-05, %v254_v46  ;;  %s825_s26 = scalar_lea.vmem %s577_s25, 256  ;;  %p830_p7 = scmp.lt.s32.totalorder %s577_s25, %s577_s25 }
 0x133   :  { %p826_p6 = scmp.ne.s32.totalorder %s577_s25, %s825_s26  ;;  %p831_p8 = scmp.lt.s32.totalorder %s825_s26, %s825_s26 }
 0x134   :  { %741 = vrsqrt.f32 %v255_v47 }
 0x135   :  { %p832_p9 = por %p831_p8, %p830_p7 }
 0x137   :  { %p833_p10 = pnand %p832_p9, %p826_p6 }
 0x141   :  { %v742_v52 = vpop.eup %741 }
 0x142   :  { %v257_v53 = vmul.f32 %v742_v52, %v230_v50 }
 0x144   :  { %v258_v55 = vmul.f32 %v257_v53, %v250_v42  ;;  %v264_v56 = vrot.slane %v257_v53, %v977_v51  ;;  %v406_v42 = vld [vmem:[%s1015_s7] sm:$0x1] }
 0x146   :  { %v259_v57 = vsub.f32 %v231_v54, %v258_v55  ;;  %v266_v58 = vmul.f32 %v264_v56, %v224_v22  ;;  %v267_v59 = vmul.f32 %v264_v56, %v227_v23 }
 0x148   :  { %v272_v60 = vrot.slane %v259_v57, %v977_v51 }
 0x14a   :  { %v275_v61 = vadd.f32 %v272_v60, %v267_v59  ;;  %v274_v62 = vadd.f32 %v272_v60, %v266_v58  ;;  %v609_v60 = vld [vmem:[%s1018_s10] ss:$0 sm:$0xff] }
 0x14c   :  { %v277_v63 = vmul.f32 0.2, %v275_v61  ;;  %v276_v1 = vmul.f32 0.2, %v274_v62 }
 0x14e   :  { %v278_v2 = vmax.f32 %v274_v62, %v276_v1  ;;  %v279_v3 = vmax.f32 %v275_v61, %v277_v63 }
 0x150   :  { %v282_v4 = vpack.c.bf16 %v279_v3, %v278_v2 }
 0x152   :  { %682 = vmatmul.mubr.bf16.vlgmr.msra.gmra.mxu1 %v282_v4 }
 0x212   :  { %v381_v13 = vpop.f32.mrf.mxu1 }
 0x213   :  { %v404_v17 = vadd.f32 %v608_v14, %v381_v13 }
 0x214   :  { %v683_v15 = vpop.f32.mrf.mxu1 }
 0x215   :  { %v417_v21 = vmul.f32 %v404_v17, %v404_v17 }
 0x216   :  { %v384_v16 = vpop.f32.mrf.mxu1 }
 0x217   :  { %v405_v18 = vadd.f32 %v608_v14, %v384_v16 }
 0x218   :  { %v684_v19 = vpop.f32.mrf.mxu1 }
 0x219   :  { %v409_v20 = vmul.f32 0.0, %v405_v18 }
 0x21b   :  { %v410_v22 = vadd.f32 %v409_v20, %v404_v17  ;;  %v418_v23 = vmul.f32 %v409_v20, %v409_v20 }
 0x21d   :  { %v411_v24 = vrot.slane %v410_v22, 4  ;;  %v419_v25 = vadd.f32 %v418_v23, %v417_v21 }
 0x21f   :  { %v412_v26 = vadd.f32 %v411_v24, %v410_v22  ;;  %v420_v0 = vrot.slane %v419_v25, 4 }
 0x221   :  { %v413_v27 = vrot.slane %v412_v26, 2  ;;  %v421_v28 = vadd.f32 %v420_v0, %v419_v25 }
 0x223   :  { %v414_v29 = vadd.f32 %v413_v27, %v412_v26  ;;  %v422_v30 = vrot.slane %v421_v28, 2 }
 0x225   :  { %v415_v31 = vrot.slane %v414_v29, 1  ;;  %v423_v32 = vadd.f32 %v422_v30, %v421_v28 }
 0x227   :  { %v416_v33 = vadd.f32 %v415_v31, %v414_v29  ;;  %v424_v34 = vrot.slane %v423_v32, 1 }
 0x229   :  { %v425_v35 = vadd.f32 %v424_v34, %v423_v32  ;;  %v426_v36 = vmul.f32 0.125, %v416_v33 }
 0x22b   :  { %v427_v37 = vmul.f32 0.125, %v425_v35  ;;  %v428_v38 = vmul.f32 %v426_v36, %v426_v36 }
 0x22d   :  { %v429_v39 = vsub.f32 %v427_v37, %v428_v38 }
 0x22f   :  { %v430_v40 = vmax.f32 %v429_v39, 0.0 }
 0x231   :  { %v431_v41 = vadd.f32 1e-05, %v430_v40 }
 0x233   :  { %743 = vrsqrt.f32 %v431_v41 }
 0x240   :  { %v744_v43 = vpop.eup %743 }
 0x241   :  { %v433_v44 = vmul.f32 %v744_v43, %v406_v42 }
 0x243   :  { %v434_v46 = vmul.f32 %v433_v44, %v426_v36  ;;  %v440_v47 = vrot.slane %v433_v44, %v977_v51 }
 0x245   :  { %v435_v48 = vsub.f32 %v407_v45, %v434_v46  ;;  %v442_v49 = vmul.f32 %v440_v47, %v404_v17  ;;  %v443_v50 = vmul.f32 %v440_v47, %v405_v18 }
 0x247   :  { %v448_v52 = vrot.slane %v435_v48, %v977_v51 }
 0x249   :  { %v450_v53 = vadd.f32 %v448_v52, %v442_v49  ;;  %v451_v54 = vadd.f32 %v448_v52, %v443_v50 }
 0x24b   :  { %v452_v55 = vmul.f32 0.2, %v450_v53  ;;  %v453_v56 = vmul.f32 0.2, %v451_v54 }
 0x24d   :  { %v455_v57 = vmax.f32 %v451_v54, %v453_v56  ;;  %v454_v58 = vmax.f32 %v450_v53, %v452_v55 }
 0x24f   :  { %v456_v59 = vpack.c.bf16 %v455_v57, %v454_v58 }
 0x251   :  { %702 = vmatmul.mubr.bf16.vlgmr.msra.gmra.mxu0 %v456_v59 }
 0x311   :  { %v562_v61 = vpop.f32.mrf.mxu0 }
 0x312   :  { %v563_v62 = vadd.f32 %v609_v60, %v562_v61 }
 0x313   :  { %v703_v63 = vpop.f32.mrf.mxu0 }
 0x314   :  { %569 = vst [vmem:[#allocation11] sm:$0xff] %v563_v62 }
 0x315   :  { %v565_v1 = vpop.f32.mrf.mxu0 }
 0x316   :  { %v566_v51 = vadd.f32 %v609_v60, %v565_v1 }
 0x317   :  { %v704_v2 = vpop.f32.mrf.mxu0 }
 0x318   :  { %570 = vst [vmem:[#allocation11 + $0x8] sm:$0xff] %v566_v51 }
 0x319   :  { %836 = shalt.err (!%p833_p10)
}
 0x31a   :  { %s862_s27 = smov 128   ;;  %s863_s10 = smov 8  }
 0x31b   :  { %582 = dma.vmem_to_hbm [thread:$0]  %s577_s25, 256, %s1019_s11, [#allocation5], %s862_s27, %s862_s27, %s863_s10  }
 0x31c   :  { %851 = dma.done.wait [#allocation5], 256  }
 0x31d   :  { %852 = vsyncadd [#allocation5], 4294967040 }
 0x31e   :  { %586 = vsyncpa [#allocation4], 1 }
 0x31f   :  { %587 = vsyncpa [#allocation7], 1 }
 0x320   :  { %588 = vsyncpa [#allocation10], 1 }
 0x321   :  { %589 = vsyncpa [#allocation5], 1 }

</bundles_post_ra>
